<compile_context>
chip_gen: v7x
topology: tpu7x:2x2x1
jax: 0.10.0
libtpu: 0.0.40
codegen_flags: <defaults>
</compile_context>

<pallas_src>
import math

import jax
import jax.numpy as jnp
from jax import lax
from jax.experimental import pallas as pl
from jax.experimental.pallas import tpu as pltpu


def _flash_attention_kernel(q_ref, k_ref, v_ref, o_ref, m_sc, l_sc, acc_sc, qs_sc):
    """One grid step: (batch b, head-block hb, q-tile qi, kv-tile kv).

    q_ref:  (1, hg, tq, D)       k_ref / v_ref: (1, hg, tkv, D)
    o_ref:  (1, tq, hg*D)        -- lane-dense output block in [B, S, H*D] layout
    m_sc/l_sc: (hg, tq, 1) f32   acc_sc: (hg, tq, D) f32
    qs_sc:  (hg, tq, D) input dtype -- Q * 1/sqrt(D), computed once per q-tile
    """
    kv_idx = pl.program_id(3)
    num_kv = pl.num_programs(3)

    @pl.when(kv_idx == 0)
    def _init():
        m_sc[...] = jnp.full(m_sc.shape, -jnp.inf, dtype=m_sc.dtype)
        l_sc[...] = jnp.zeros(l_sc.shape, dtype=l_sc.dtype)
        acc_sc[...] = jnp.zeros(acc_sc.shape, dtype=acc_sc.dtype)
        # Fold 1/sqrt(D) into Q once per (b, hb, qi) instead of every kv step;
        # multiply in the input dtype (no f32 cast-mul-cast round trip).
        inv_scale = 1.0 / math.sqrt(q_ref.shape[-1])
        qs_sc[...] = q_ref[0] * inv_scale

    q = qs_sc[...]          # (hg, tq, D), input dtype, pre-scaled
    k = k_ref[0]            # (hg, tkv, D)
    v = v_ref[0]            # (hg, tkv, D)

    # scores: (hg, tq, tkv) = Q @ K^T -- contraction over D of both operands
    # (no explicit K transpose), f32 accumulation on the MXU.
    s = lax.dot_general(
        q, k,
        dimension_numbers=(((2,), (2,)), ((0,), (0,))),
        preferred_element_type=jnp.float32,
    )

    # Online (running) softmax update.
    m_prev = m_sc[...]                                    # (hg, tq, 1)
    m_new = jnp.maximum(m_prev, jnp.max(s, axis=-1, keepdims=True))
    alpha = jnp.exp(m_prev - m_new)                       # rescale old stats
    p = jnp.exp(s - m_new)                                # (hg, tq, tkv), f32

    l_sc[...] = alpha * l_sc[...] + jnp.sum(p, axis=-1, keepdims=True)

    pv = lax.dot_general(
        p.astype(v.dtype), v,
        dimension_numbers=(((2,), (1,)), ((0,), (0,))),
        preferred_element_type=jnp.float32,
    )                                                     # (hg, tq, D), f32
    acc_sc[...] = alpha * acc_sc[...] + pv
    m_sc[...] = m_new

    @pl.when(kv_idx == num_kv - 1)
    def _finalize():
        # One EUP reciprocal on the (hg, tq, 1) denominator + one multiply over
        # the accumulator, instead of hg separate full-width f32 divides.
        inv_l = pl.reciprocal(l_sc[...], approx=True)     # (hg, tq, 1)
        hg = acc_sc.shape[0]
        # Build a single lane-dense (tq, hg*D) tile (heads concatenated along
        # the lane axis, matching the [B, S, H*D] output layout) and issue ONE
        # unmasked full-block store.
        cols = [(acc_sc[h] * inv_l[h]).astype(o_ref.dtype) for h in range(hg)]
        o_ref[0] = cols[0] if hg == 1 else jnp.concatenate(cols, axis=-1)


def _pick_tile(s, cap):
    """Largest divisor of s that is <= cap, preferring sublane-friendly
    multiples of 8 (or the full extent s)."""
    cap = max(1, min(cap, s))
    fallback = None
    for c in range(cap, 0, -1):
        if s % c == 0:
            if c == s or c % 8 == 0:
                return c
            if fallback is None:
                fallback = c
    return fallback if fallback is not None else s


def _pick_head_group(H, D):
    """Smallest head group whose fused output width hg*D is lane-aligned
    (multiple of 128) and wide enough to amortize the grid-step overhead.
    Keeping hg small keeps the (hg, tq, tkv) f32 score/softmax temporaries
    small so tq can grow within v7x's 64 MiB VMEM."""
    divisors = [h for h in range(1, H + 1) if H % h == 0]
    for hg in divisors:
        if hg <= 8 and (hg * D) % 128 == 0 and hg * D >= 512:
            return hg
    for hg in divisors:
        if (hg * D) % 128 == 0:
            return hg
    return H


def _vmem_bytes_estimate(hg, tq, tkv, D, esize):
    """Rough per-step VMEM footprint: double-buffered I/O blocks, scratch
    (including the 1->128 lane padding of m/l), and the compiler-materialized
    f32 score/softmax temporaries."""
    q_io = 2 * hg * tq * D * esize            # Q block (double-buffered)
    kv_io = 2 * 2 * hg * tkv * D * esize      # K and V blocks
    o_io = 2 * tq * hg * D * esize            # output block
    acc = hg * tq * D * 4                     # f32 accumulator scratch
    ml = 2 * hg * tq * 128 * 4                # m/l scratch, lane-padded 1 -> 128
    qs = hg * tq * D * esize                  # pre-scaled Q scratch
    sp = 3 * hg * tq * tkv * 4                # s, p (+ exp temp), f32
    return q_io + kv_io + o_io + acc + ml + qs + sp


def standard_attention(Q, K, V, *, tq=None, tkv=None, head_group=None):
    """Pallas implementation of StandardAttention.forward.

    Q, K, V: [B, H, S, D]  ->  returns [B, S, H*D]
    """
    B, H, S, D = Q.shape
    esize = jnp.dtype(Q.dtype).itemsize

    # Physical VMEM (v5e/v6e: 128 MiB, v7x: 64 MiB/TC). Fall back to the
    # v7x-safe 64 MiB if the query is unavailable.
    try:
        vmem_cap = int(pltpu.get_tpu_info().vmem_capacity_bytes)
    except Exception:
        vmem_cap = 64 * 1024 * 1024
    try:
        kind = jax.devices()[0].device_kind.lower()
    except Exception:
        kind = ""
    is_v5 = "v5" in kind

    vmem_limit = max(int(vmem_cap * 0.75), 32 * 1024 * 1024)
    budget = int(vmem_limit * 0.8)

    hg = head_group if head_group is not None else _pick_head_group(H, D)

    # v5e's MXU/HBM ridge (~240 flop/byte) is already reached at tq=256; on
    # v6e/v7x push tq toward 1024 (K/V re-streaming intensity = 2*tq/bytes) and
    # let the VMEM budget clamp it (v7x's 64 MiB typically lands around 512).
    tq_target = 256 if is_v5 else 1024
    tkv_target = 128 if is_v5 else 256

    auto_tq, auto_tkv = tq is None, tkv is None
    if auto_tkv:
        tkv = _pick_tile(S, tkv_target)
    if auto_tq:
        tq = _pick_tile(S, tq_target)
    if auto_tq:
        while tq > 8 and _vmem_bytes_estimate(hg, tq, tkv, D, esize) > budget:
            tq = _pick_tile(S, tq // 2)
    if auto_tkv:
        while tkv > 8 and _vmem_bytes_estimate(hg, tq, tkv, D, esize) > budget:
            tkv = _pick_tile(S, tkv // 2)

    grid = (B, H // hg, S // tq, S // tkv)

    out = pl.pallas_call(
        _flash_attention_kernel,
        out_shape=jax.ShapeDtypeStruct((B, S, H * D), Q.dtype),
        grid_spec=pltpu.PrefetchScalarGridSpec(
            num_scalar_prefetch=0,
            grid=grid,
            in_specs=[
                pl.BlockSpec((1, hg, tq, D), lambda b, hb, qi, kv: (b, hb, qi, 0)),
                pl.BlockSpec((1, hg, tkv, D), lambda b, hb, qi, kv: (b, hb, kv, 0)),
                pl.BlockSpec((1, hg, tkv, D), lambda b, hb, qi, kv: (b, hb, kv, 0)),
            ],
            # Output block index is constant along the KV axis -> it stays
            # resident in VMEM across the reduction (accumulator pattern), and
            # its (1, tq, hg*D) shape makes the epilogue store lane-dense.
            out_specs=pl.BlockSpec((1, tq, hg * D), lambda b, hb, qi, kv: (b, qi, hb)),
            scratch_shapes=[
                pltpu.VMEM((hg, tq, 1), jnp.float32),   # running max m (lane-padded; budgeted)
                pltpu.VMEM((hg, tq, 1), jnp.float32),   # running denominator l
                pltpu.VMEM((hg, tq, D), jnp.float32),   # output accumulator
                pltpu.VMEM((hg, tq, D), Q.dtype),       # pre-scaled Q (hoisted out of kv loop)
            ],
        ),
        compiler_params=pltpu.CompilerParams(
            # B, head-block and Q-tile axes are parallel (megacore sharding);
            # only the KV reduction axis is "arbitrary".
            dimension_semantics=("parallel", "parallel", "parallel", "arbitrary"),
            vmem_limit_bytes=vmem_limit,
        ),
    )(Q, K, V)

    # Output is already [B, S, H*D].
    return out


def _reference(Q, K, V):
    """Pure-JAX reference mirroring the PyTorch module (f32 on TPU)."""
    B, H, S, D = Q.shape
    scale = jnp.sqrt(jnp.float32(D))
    s = jnp.einsum(
        "bhqd,bhkd->bhqk", Q.astype(jnp.float32), K.astype(jnp.float32)
    ) / scale
    p = jax.nn.softmax(s, axis=-1)
    o = jnp.einsum("bhqk,bhkd->bhqd", p, V.astype(jnp.float32))
    return o.transpose(0, 2, 1, 3).reshape(B, S, H * D).astype(Q.dtype)


if __name__ == "__main__":
    # Small shapes: batch=2, heads=4, seq=8, head_dim=32.
    B, H, S, D = 2, 4, 8, 32
    key = jax.random.PRNGKey(0)
    kq, kk, kvk = jax.random.split(key, 3)
    Q = jax.random.normal(kq, (B, H, S, D), dtype=jnp.float32)
    K = jax.random.normal(kk, (B, H, S, D), dtype=jnp.float32)
    V = jax.random.normal(kvk, (B, H, S, D), dtype=jnp.float32)

    out = standard_attention(Q, K, V)
    out = jax.block_until_ready(out)

    ref = _reference(Q, K, V)
    assert out.shape == (B, S, H * D), out.shape
    # Tolerance covers the EUP approximate-reciprocal normalization (~1e-4 rel).
    assert jnp.allclose(out, ref, atol=2e-3, rtol=2e-3), (
        float(jnp.max(jnp.abs(out - ref)))
    )

    print("KERNEL_OK")
</pallas_src>

<mosaic_0001>
module attributes {stable_mosaic.version = 11 : i64} {
  func.func @_flash_attention_kernel(%arg0: i32, %arg1: i32, %arg2: i32, %arg3: i32, %arg4: memref<1x4x8x32xf32, #tpu.memory_space<vmem>>, %arg5: memref<1x4x8x32xf32, #tpu.memory_space<vmem>>, %arg6: memref<1x4x8x32xf32, #tpu.memory_space<vmem>>, %arg7: memref<1x8x128xf32, #tpu.memory_space<vmem>>, %arg8: memref<4x8x1xf32, #tpu.memory_space<vmem>>, %arg9: memref<4x8x1xf32, #tpu.memory_space<vmem>>, %arg10: memref<4x8x32xf32, #tpu.memory_space<vmem>>, %arg11: memref<4x8x32xf32, #tpu.memory_space<vmem>>) attributes {dimension_semantics = [#tpu.dimension_semantics<parallel>, #tpu.dimension_semantics<parallel>, #tpu.dimension_semantics<parallel>, #tpu.dimension_semantics<arbitrary>], iteration_bounds = array<i64: 2, 1, 1, 1>, scalar_prefetch = 0 : i64, scratch_operands = 4 : i64, tpu.core_type = #tpu.core_type<tc>, window_params = [{transform_indices = @transform_0, window_bounds = array<i64: 1, 4, 8, 32>}, {transform_indices = @transform_1, window_bounds = array<i64: 1, 4, 8, 32>}, {transform_indices = @transform_2, window_bounds = array<i64: 1, 4, 8, 32>}, {transform_indices = @transform_3, window_bounds = array<i64: 1, 8, 128>}]} {
    %c0_i32 = arith.constant 0 : i32
    %0 = arith.cmpi eq, %arg3, %c0_i32 : i32
    %1 = arith.extui %0 : i1 to i32
    %c0_i32_0 = arith.constant 0 : i32
    %2 = arith.cmpi ne, %1, %c0_i32_0 : i32
    scf.if %2 {
      %cst_34 = arith.constant 0xFF800000 : f32
      %34 = vector.broadcast %cst_34 : f32 to vector<4x8x1xf32>
      %c0_35 = arith.constant 0 : index
      %c0_36 = arith.constant 0 : index
      %c0_37 = arith.constant 0 : index
      %35 = vector.load %arg8[%c0_35, %c0_36, %c0_37] : memref<4x8x1xf32, #tpu.memory_space<vmem>>, vector<4x8x1xf32>
      tpu.vector_store %arg8[%c0_35, %c0_36, %c0_37], %34 {strides = array<i32>} : memref<4x8x1xf32, #tpu.memory_space<vmem>>, vector<4x8x1xf32>,
      %cst_38 = arith.constant 0.000000e+00 : f32
      %36 = vector.broadcast %cst_38 : f32 to vector<4x8x1xf32>
      %c0_39 = arith.constant 0 : index
      %c0_40 = arith.constant 0 : index
      %c0_41 = arith.constant 0 : index
      %37 = vector.load %arg9[%c0_39, %c0_40, %c0_41] : memref<4x8x1xf32, #tpu.memory_space<vmem>>, vector<4x8x1xf32>
      tpu.vector_store %arg9[%c0_39, %c0_40, %c0_41], %36 {strides = array<i32>} : memref<4x8x1xf32, #tpu.memory_space<vmem>>, vector<4x8x1xf32>,
      %cst_42 = arith.constant 0.000000e+00 : f32
      %38 = vector.broadcast %cst_42 : f32 to vector<4x8x32xf32>
      %c0_43 = arith.constant 0 : index
      %c0_44 = arith.constant 0 : index
      %c0_45 = arith.constant 0 : index
      %39 = vector.load %arg10[%c0_43, %c0_44, %c0_45] : memref<4x8x32xf32, #tpu.memory_space<vmem>>, vector<4x8x32xf32>
      tpu.vector_store %arg10[%c0_43, %c0_44, %c0_45], %38 {strides = array<i32>} : memref<4x8x32xf32, #tpu.memory_space<vmem>>, vector<4x8x32xf32>,
      %c0_46 = arith.constant 0 : index
      %c0_47 = arith.constant 0 : index
      %c0_48 = arith.constant 0 : index
      %c0_49 = arith.constant 0 : index
      %40 = vector.load %arg4[%c0_46, %c0_47, %c0_48, %c0_49] : memref<1x4x8x32xf32, #tpu.memory_space<vmem>>, vector<1x4x8x32xf32>
      %41 = vector.shape_cast %40 : vector<1x4x8x32xf32> to vector<4x8x32xf32>
      %cst_50 = arith.constant 0.176776692 : f32
      %42 = vector.broadcast %cst_50 : f32 to vector<4x8x32xf32>
      %43 = arith.mulf %41, %42 : vector<4x8x32xf32>
      %c0_51 = arith.constant 0 : index
      %c0_52 = arith.constant 0 : index
      %c0_53 = arith.constant 0 : index
      %44 = vector.load %arg11[%c0_51, %c0_52, %c0_53] : memref<4x8x32xf32, #tpu.memory_space<vmem>>, vector<4x8x32xf32>
      tpu.vector_store %arg11[%c0_51, %c0_52, %c0_53], %43 {strides = array<i32>} : memref<4x8x32xf32, #tpu.memory_space<vmem>>, vector<4x8x32xf32>,
    } else {
    }
    %c0 = arith.constant 0 : index
    %c0_1 = arith.constant 0 : index
    %c0_2 = arith.constant 0 : index
    %3 = vector.load %arg11[%c0, %c0_1, %c0_2] : memref<4x8x32xf32, #tpu.memory_space<vmem>>, vector<4x8x32xf32>
    %c0_3 = arith.constant 0 : index
    %c0_4 = arith.constant 0 : index
    %c0_5 = arith.constant 0 : index
    %c0_6 = arith.constant 0 : index
    %4 = vector.load %arg5[%c0_3, %c0_4, %c0_5, %c0_6] : memref<1x4x8x32xf32, #tpu.memory_space<vmem>>, vector<1x4x8x32xf32>
    %5 = vector.shape_cast %4 : vector<1x4x8x32xf32> to vector<4x8x32xf32>
    %c0_7 = arith.constant 0 : index
    %c0_8 = arith.constant 0 : index
    %c0_9 = arith.constant 0 : index
    %c0_10 = arith.constant 0 : index
    %6 = vector.load %arg6[%c0_7, %c0_8, %c0_9, %c0_10] : memref<1x4x8x32xf32, #tpu.memory_space<vmem>>, vector<1x4x8x32xf32>
    %7 = vector.shape_cast %6 : vector<1x4x8x32xf32> to vector<4x8x32xf32>
    %cst = arith.constant dense<0.000000e+00> : vector<4x8x8xf32>
    %8 = tpu.matmul %3, %5, %cst {dimension_numbers = #tpu.dot_dimension_numbers<[2], [2], [1], [1], [0, 0, 0, 1, 1, 1], [0], [0]>} : vector<4x8x32xf32>, vector<4x8x32xf32>, vector<4x8x8xf32> -> vector<4x8x8xf32>
    %c0_11 = arith.constant 0 : index
    %c0_12 = arith.constant 0 : index
    %c0_13 = arith.constant 0 : index
    %9 = vector.load %arg8[%c0_11, %c0_12, %c0_13] : memref<4x8x1xf32, #tpu.memory_space<vmem>>, vector<4x8x1xf32>
    %cst_14 = arith.constant dense<0xFF800000> : vector<4x8xf32>
    %10 = vector.multi_reduction <maximumf>, %8, %cst_14 [2] : vector<4x8x8xf32> to vector<4x8xf32>
    %11 = vector.shape_cast %10 : vector<4x8xf32> to vector<4x8x1xf32>
    %12 = arith.maximumf %9, %11 : vector<4x8x1xf32>
    %13 = arith.subf %9, %12 : vector<4x8x1xf32>
    %14 = math.exp %13 : vector<4x8x1xf32>
    %15 = vector.broadcast %12 : vector<4x8x1xf32> to vector<4x8x8xf32>
    %16 = arith.subf %8, %15 : vector<4x8x8xf32>
    %17 = math.exp %16 : vector<4x8x8xf32>
    %c0_15 = arith.constant 0 : index
    %c0_16 = arith.constant 0 : index
    %c0_17 = arith.constant 0 : index
    %18 = vector.load %arg9[%c0_15, %c0_16, %c0_17] : memref<4x8x1xf32, #tpu.memory_space<vmem>>, vector<4x8x1xf32>
    %19 = arith.mulf %14, %18 : vector<4x8x1xf32>
    %cst_18 = arith.constant dense<0.000000e+00> : vector<4x8xf32>
    %20 = vector.multi_reduction <add>, %17, %cst_18 [2] : vector<4x8x8xf32> to vector<4x8xf32>
    %21 = vector.shape_cast %20 : vector<4x8xf32> to vector<4x8x1xf32>
    %22 = arith.addf %19, %21 : vector<4x8x1xf32>
    %c0_19 = arith.constant 0 : index
    %c0_20 = arith.constant 0 : index
    %c0_21 = arith.constant 0 : index
    %23 = vector.load %arg9[%c0_19, %c0_20, %c0_21] : memref<4x8x1xf32, #tpu.memory_space<vmem>>, vector<4x8x1xf32>
    tpu.vector_store %arg9[%c0_19, %c0_20, %c0_21], %22 {strides = array<i32>} : memref<4x8x1xf32, #tpu.memory_space<vmem>>, vector<4x8x1xf32>,
    %cst_22 = arith.constant dense<0.000000e+00> : vector<4x8x32xf32>
    %24 = tpu.matmul %17, %7, %cst_22 {dimension_numbers = #tpu.dot_dimension_numbers<[2], [1], [1], [2], [0, 0, 0, 1, 1, 2], [0], [0]>} : vector<4x8x8xf32>, vector<4x8x32xf32>, vector<4x8x32xf32> -> vector<4x8x32xf32>
    %c0_23 = arith.constant 0 : index
    %c0_24 = arith.constant 0 : index
    %c0_25 = arith.constant 0 : index
    %25 = vector.load %arg10[%c0_23, %c0_24, %c0_25] : memref<4x8x32xf32, #tpu.memory_space<vmem>>, vector<4x8x32xf32>
    %26 = vector.broadcast %14 : vector<4x8x1xf32> to vector<4x8x32xf32>
    %27 = arith.mulf %26, %25 : vector<4x8x32xf32>
    %28 = arith.addf %27, %24 : vector<4x8x32xf32>
    %c0_26 = arith.constant 0 : index
    %c0_27 = arith.constant 0 : index
    %c0_28 = arith.constant 0 : index
    %29 = vector.load %arg10[%c0_26, %c0_27, %c0_28] : memref<4x8x32xf32, #tpu.memory_space<vmem>>, vector<4x8x32xf32>
    tpu.vector_store %arg10[%c0_26, %c0_27, %c0_28], %28 {strides = array<i32>} : memref<4x8x32xf32, #tpu.memory_space<vmem>>, vector<4x8x32xf32>,
    %c0_29 = arith.constant 0 : index
    %c0_30 = arith.constant 0 : index
    %c0_31 = arith.constant 0 : index
    %30 = vector.load %arg8[%c0_29, %c0_30, %c0_31] : memref<4x8x1xf32, #tpu.memory_space<vmem>>, vector<4x8x1xf32>
    tpu.vector_store %arg8[%c0_29, %c0_30, %c0_31], %12 {strides = array<i32>} : memref<4x8x1xf32, #tpu.memory_space<vmem>>, vector<4x8x1xf32>,
    %c0_i32_32 = arith.constant 0 : i32
    %31 = arith.cmpi eq, %arg3, %c0_i32_32 : i32
    %32 = arith.extui %31 : i1 to i32
    %c0_i32_33 = arith.constant 0 : i32
    %33 = arith.cmpi ne, %32, %c0_i32_33 : i32
    scf.if %33 {
      %c0_34 = arith.constant 0 : index
      %c0_35 = arith.constant 0 : index
      %c0_36 = arith.constant 0 : index
      %34 = vector.load %arg9[%c0_34, %c0_35, %c0_36] : memref<4x8x1xf32, #tpu.memory_space<vmem>>, vector<4x8x1xf32>
      %35 = tpu.reciprocal %34 {approx = true} : vector<4x8x1xf32> -> vector<4x8x1xf32>
      %c0_37 = arith.constant 0 : index
      %c0_38 = arith.constant 0 : index
      %c0_39 = arith.constant 0 : index
      %36 = vector.load %arg10[%c0_37, %c0_38, %c0_39] : memref<4x8x32xf32, #tpu.memory_space<vmem>>, vector<1x8x32xf32>
      %37 = vector.shape_cast %36 : vector<1x8x32xf32> to vector<8x32xf32>
      %38 = vector.extract_strided_slice %35 {offsets = [0, 0, 0], sizes = [1, 8, 1], strides = [1, 1, 1]} : vector<4x8x1xf32> to vector<1x8x1xf32>
      %39 = vector.shape_cast %38 : vector<1x8x1xf32> to vector<8x1xf32>
      %40 = vector.broadcast %39 : vector<8x1xf32> to vector<8x32xf32>
      %41 = arith.mulf %37, %40 : vector<8x32xf32>
      %c1 = arith.constant 1 : index
      %c0_40 = arith.constant 0 : index
      %c0_41 = arith.constant 0 : index
      %42 = vector.load %arg10[%c1, %c0_40, %c0_41] : memref<4x8x32xf32, #tpu.memory_space<vmem>>, vector<1x8x32xf32>
      %43 = vector.shape_cast %42 : vector<1x8x32xf32> to vector<8x32xf32>
      %44 = vector.extract_strided_slice %35 {offsets = [1, 0, 0], sizes = [1, 8, 1], strides = [1, 1, 1]} : vector<4x8x1xf32> to vector<1x8x1xf32>
      %45 = vector.shape_cast %44 : vector<1x8x1xf32> to vector<8x1xf32>
      %46 = vector.broadcast %45 : vector<8x1xf32> to vector<8x32xf32>
      %47 = arith.mulf %43, %46 : vector<8x32xf32>
      %c2 = arith.constant 2 : index
      %c0_42 = arith.constant 0 : index
      %c0_43 = arith.constant 0 : index
      %48 = vector.load %arg10[%c2, %c0_42, %c0_43] : memref<4x8x32xf32, #tpu.memory_space<vmem>>, vector<1x8x32xf32>
      %49 = vector.shape_cast %48 : vector<1x8x32xf32> to vector<8x32xf32>
      %50 = vector.extract_strided_slice %35 {offsets = [2, 0, 0], sizes = [1, 8, 1], strides = [1, 1, 1]} : vector<4x8x1xf32> to vector<1x8x1xf32>
      %51 = vector.shape_cast %50 : vector<1x8x1xf32> to vector<8x1xf32>
      %52 = vector.broadcast %51 : vector<8x1xf32> to vector<8x32xf32>
      %53 = arith.mulf %49, %52 : vector<8x32xf32>
      %c3 = arith.constant 3 : index
      %c0_44 = arith.constant 0 : index
      %c0_45 = arith.constant 0 : index
      %54 = vector.load %arg10[%c3, %c0_44, %c0_45] : memref<4x8x32xf32, #tpu.memory_space<vmem>>, vector<1x8x32xf32>
      %55 = vector.shape_cast %54 : vector<1x8x32xf32> to vector<8x32xf32>
      %56 = vector.extract_strided_slice %35 {offsets = [3, 0, 0], sizes = [1, 8, 1], strides = [1, 1, 1]} : vector<4x8x1xf32> to vector<1x8x1xf32>
      %57 = vector.shape_cast %56 : vector<1x8x1xf32> to vector<8x1xf32>
      %58 = vector.broadcast %57 : vector<8x1xf32> to vector<8x32xf32>
      %59 = arith.mulf %55, %58 : vector<8x32xf32>
      %60 = tpu.concatenate %41, %47, %53, %59 in 1 : vector<8x32xf32>, vector<8x32xf32>, vector<8x32xf32>, vector<8x32xf32> -> vector<8x128xf32>
      %c0_46 = arith.constant 0 : index
      %c0_47 = arith.constant 0 : index
      %c0_48 = arith.constant 0 : index
      %61 = vector.load %arg7[%c0_46, %c0_47, %c0_48] : memref<1x8x128xf32, #tpu.memory_space<vmem>>, vector<1x8x128xf32>
      %62 = vector.shape_cast %61 : vector<1x8x128xf32> to vector<8x128xf32>
      %63 = vector.shape_cast %60 : vector<8x128xf32> to vector<1x8x128xf32>
      tpu.vector_store %arg7[%c0_46, %c0_47, %c0_48], %63 {strides = array<i32>} : memref<1x8x128xf32, #tpu.memory_space<vmem>>, vector<1x8x128xf32>,
    } else {
    }
    return
  }
  func.func @transform_0(%arg0: i32, %arg1: i32, %arg2: i32, %arg3: i32) -> (i32, i32, i32, i32) {
    %c0_i32 = arith.constant 0 : i32
    %c0_i32_0 = arith.constant 0 : i32
    return %arg0, %arg1, %arg2, %c0_i32 : i32, i32, i32, i32
  }
  func.func @transform_1(%arg0: i32, %arg1: i32, %arg2: i32, %arg3: i32) -> (i32, i32, i32, i32) {
    %c0_i32 = arith.constant 0 : i32
    %c0_i32_0 = arith.constant 0 : i32
    return %arg0, %arg1, %arg3, %c0_i32 : i32, i32, i32, i32
  }
  func.func @transform_2(%arg0: i32, %arg1: i32, %arg2: i32, %arg3: i32) -> (i32, i32, i32, i32) {
    %c0_i32 = arith.constant 0 : i32
    %c0_i32_0 = arith.constant 0 : i32
    return %arg0, %arg1, %arg3, %c0_i32 : i32, i32, i32, i32
  }
  func.func @transform_3(%arg0: i32, %arg1: i32, %arg2: i32, %arg3: i32) -> (i32, i32, i32) {
    %c0_i32 = arith.constant 0 : i32
    return %arg0, %arg2, %arg1 : i32, i32, i32
  }
}

</mosaic_0001>

<bundles_post_ra>
// kernel: tpu_custom_call.1
= control target key start
LH: loop header
LB: loop body
LE: loop exit
PB: predicated region body
PF: predicated region fallthrough
CT: control target
= control target key end

     0   :  { %s2116_s0 = inlined_call_operand.hbm [shape: f32[2,4,8,32], index: 0, kind: input, shape index: {}]   ;;  %s2117_s1 = inlined_call_operand.hbm [shape: f32[2,4,8,32], index: 1, kind: input, shape index: {}]   ;;  %s2118_s2 = inlined_call_operand.hbm [shape: f32[2,4,8,32], index: 2, kind: input, shape index: {}]   ;;  %s2119_s3 = inlined_call_operand.hbm [shape: f32[2,8,128], index: 3, kind: output, shape index: {}]  }
   0x1   :  { %2129 = sst [smem:[#allocation19_spill]] %s2117_s1 }
   0x2   :  { %8 = vsyncpa [#allocation7], 0 }
   0x3   :  { %10 = vsyncpa [#allocation7 + $0x1], 0 }
   0x4   :  { %11 = vsyncpa [#allocation10], 0 }
   0x5   :  { %13 = vsyncpa [#allocation10 + $0x1], 0 }
   0x6   :  { %14 = vsyncpa [#allocation8], 0 }
   0x7   :  { %16 = vsyncpa [#allocation8 + $0x1], 0  ;;  %s1721_s12 = smov 0   ;;  %s1723_s13 = smov 0  }
   0x8   :  { %s1725_s14 = smov 0   ;;  %s1727_s15 = smov 0  }
   0x9   :  { %s1729_s16 = smov 0   ;;  %s1731_s17 = smov 0  }
   0xa LB: > { %2130 = sst [smem:[#allocation16_spill]] %s1682_s16  ;;  %s1752_s18 = sadd.s32 4294967295, %s1686_s17   ;;  %s1686_s17 = sphi %s1731_s17, %s22_s17   ;;  %s1682_s16 = sphi %s1729_s16, %s2153_s16   ;;  %s1678_s15 = sphi %s1727_s15, %s2152_s15   ;;  %s1674_s14 = sphi %s1725_s14, %s2156_s14   ;;  %s1670_s13 = sphi %s1723_s13, %s2155_s13   ;;  %s1666_s12 = sphi %s1721_s12, %s2154_s12  }
   0xb   : > { %s1311_s19 = sadd.s32 4294967294, %s1686_s17   ;;  %s48_s20 = sadd.s32 1, %s1682_s16 }
   0xc   : > { %s59_s21 = sadd.s32 1, %s1674_s14  ;;  %p50_p0 = scmp.ge.s32.totalorder %s48_s20, 2 }
   0xd   : > { %p66_p1 = scmp.ne.s32.totalorder %s1674_s14, %s1670_s13  ;;  %p67_p2 = scmp.eq.s32.totalorder %s1686_s17, 0 }
   0xe   : > { %p72_p3 = scmp.ne.s32.totalorder %s1670_s13, %s1666_s12  ;;  %s2158_s20 = smov (%p50_p0, %s48_s20), 0 }
   0xf   : > { %2131 = sst [smem:[#allocation17_spill]] %s2158_s20  ;;  %p1764_p4 = por %p67_p2, %p66_p1 }
  0x10   : > { %p73_p5 = scmp.eq.s32.totalorder %s1752_s18, 0  ;;  %s52_s23 = ssub.s32 %s1682_s16, %s2158_s20 }
  0x11   : > { %p160_p6 = scmp.eq.s32.totalorder %s1752_s18, 1  ;;  %p57_p7 = scmp.eq.s32.totalorder %s52_s23, 0 }
  0x12   : > { %p1772_p8 = por %p73_p5, %p72_p3  ;;  %p166_p10 = scmp.eq.s32.totalorder %s1311_s19, 1 }
  0x13   : > { %p1776_p9 = por %p160_p6, %p66_p1  ;;  %p1425_p13 = scmp.lt.s32.totalorder %s1686_s17, 2 }
  0x14   : > { %s2133_s24 = scalar_select %p1772_p8, 1, 0 }
  0x15   : > { %s2134_s25 = scalar_select %p1776_p9, 1, 0 }
  0x16   : > { %s1781_s26 = scalar_select %p57_p7, %s1674_s14, %s59_s21  }
  0x17   : > { %p1783_p11 = por %p166_p10, %p72_p3  ;;  %s2122_s28 = sand.u32 1, %s1674_s14  }
  0x18   : > { %2135 = sst [smem:[#allocation18_spill]] %s1781_s26  ;;  %s1792_s29 = sshll.u32 %s2122_s28, 5 }
  0x19   : > { %s2136_s27 = scalar_select %p1783_p11, 1, 0 }
  0x1a   : > { %s1795_s30 = sshll.u32 %s1682_s16, 9  ;;  %p1799_p0 = pnand %p1425_p13, %p1764_p4 }
  0x1b   : > { %s210_s5 = sand.u32 1, %s1686_s17   ;;  %s2138_s1 = sld [smem:[#allocation19_spill]] }
  0x1c   : > { %s214_s9 = scalar_lea.vmem [#allocation9], %s1792_s29  ;;  %s1815_s11 = scalar_lea.sflag [#allocation10], %s210_s5 }
  0x1d   : > { %s224_s10 = sshll.u32 %s214_s9, 4  ;;  %p1821_p4 = pneg %p1799_p0  ;;  %s1812_s10 = int_to_ptr.vmem [resolvable:$true] %s224_s10 }
  0x21   : > { %s1808_s8 = scalar_lea.hbm %s2138_s1, %s1795_s30  ;;  %s1515_s6 = scalar_lea.hbm %s2138_s1, 1024 }
  0x22   : > { %s1510_s19 = scalar_lea.hbm %s1808_s8, 512  ;;  %p1516_p7 = scmp.lt.u32.totalorder %s1808_s8, %s2138_s1 }
  0x23   : > { %p1511_p3 = scmp.ne.s32.totalorder %s1808_s8, %s1510_s19  ;;  %p1517_p10 = scmp.lt.u32.totalorder %s1515_s6, %s1510_s19 }
  0x24   : > { %p1519_p12 = scmp.lt.u32.totalorder %s1510_s19, %s1808_s8 }
  0x25   : > { %p1513_p5 = pnand %p1821_p4, %p1511_p3  ;;  %p1518_p13 = por %p1517_p10, %p1516_p7 }
  0x27   : > { %p1514_p6 = pneg %p1513_p5  ;;  %p1520_p1 = por %p1519_p12, %p1518_p13 }
  0x29   : > { %p1521_p2 = pnand %p1520_p1, %p1514_p6 }
  0x2b   : > { %1524 = shalt.err (!%p1521_p2)
}
  0x2c   : > { %s1525_s5 = scalar_lea.vmem %s1812_s10, 512  ;;  %s1688_s22 = smov [#allocation9]  }
  0x2d   : > { %p1526_p3 = scmp.ne.s32.totalorder %s1812_s10, %s1525_s5  ;;  %s1530_s23 = sshll.u32 %s1688_s22, 4  ;;  %s1531_s23 = int_to_ptr.vmem [resolvable:$false] %s1530_s23 }
  0x2e   : > { %s1532_s7 = scalar_lea.vmem %s1531_s23, 1024  ;;  %p1533_p9 = scmp.lt.s32.totalorder %s1812_s10, %s1531_s23 }
  0x2f   : > { %p1528_p5 = pnand %p1526_p3, %p1821_p4  ;;  %p1534_p8 = scmp.lt.s32.totalorder %s1532_s7, %s1525_s5 }
  0x31   : > { %p1529_p11 = pneg %p1528_p5  ;;  %p1535_p7 = por %p1534_p8, %p1533_p9 }
  0x33   : > { %p1536_p10 = pnand %p1535_p7, %p1529_p11 }
  0x35   : > { %1539 = shalt.err (!%p1536_p10)
}
  0x36   : > { %s2123_s19 = smov 128   ;;  %s2125_s6 = smov 8  }
  0x37   : > { %1417 = dma.hbm_to_vmem [thread:$0]  (!%p1799_p0), %s1808_s8, 512, %s1812_s10, %s1815_s11, %s2123_s19, %s2123_s19, %s2125_s6  }
  0x38   : > { %p2140_p8 = scmp.lt.s32.totalorder %s1686_s17, 3  ;;  %p2141_p9 = scmp.ge.s32.totalorder %s1686_s17, 1 }
  0x39   : > { %s1860_s23 = scalar_lea.hbm %s2116_s0, %s1795_s30  ;;  %s190_s7 = scalar_lea.vmem [#allocation6], %s1792_s29 }
  0x3a   : > { %p1852_p11 = pnand %p2141_p9, %p2140_p8  ;;  %s200_s28 = sshll.u32 %s190_s7, 4  ;;  %s1863_s28 = int_to_ptr.vmem [resolvable:$true] %s200_s28 }
  0x3b   : > { %s1869_s19 = scalar_lea.hbm %s2118_s2, %s1795_s30  ;;  %s2143_s6 = sand.u32 1, %s1674_s14  }
  0x3c   : > { %s2142_s9 = scalar_select %p1852_p11, 1, 0 }
  0x3d   : > { %s1873_s1 = scalar_lea.sflag [#allocation7], %s2143_s6  ;;  %s1540_s20 = scalar_lea.hbm %s1860_s23, 512 }
  0x3e   : > { %p1541_p12 = scmp.ne.s32.totalorder %s1860_s23, %s1540_s20  ;;  %s1545_s16 = scalar_lea.hbm %s2116_s0, 1024 }
  0x3f   : > { %p1546_p6 = scmp.lt.u32.totalorder %s1860_s23, %s2116_s0  ;;  %p1547_p13 = scmp.lt.u32.totalorder %s1545_s16, %s1540_s20 }
  0x40   : > { %p1543_p1 = pnand %p1541_p12, %p1821_p4  ;;  %p1549_p5 = scmp.lt.u32.totalorder %s1540_s20, %s1860_s23 }
  0x41   : > { %p1548_p3 = por %p1547_p13, %p1546_p6 }
  0x42   : > { %p1544_p2 = pneg %p1543_p1 }
  0x43   : > { %p1550_p7 = por %p1549_p5, %p1548_p3 }
  0x45   : > { %p1551_p10 = pnand %p1550_p7, %p1544_p2 }
  0x47   : > { %1554 = shalt.err (!%p1551_p10)
}
  0x48   : > { %s1555_s30 = scalar_lea.vmem %s1863_s28, 512  ;;  %s1691_s6 = smov [#allocation6]  }
  0x49   : > { %p1556_p8 = scmp.ne.s32.totalorder %s1863_s28, %s1555_s30  ;;  %s1560_s8 = sshll.u32 %s1691_s6, 4  ;;  %s1561_s8 = int_to_ptr.vmem [resolvable:$false] %s1560_s8 }
  0x4a   : > { %s1562_s26 = scalar_lea.vmem %s1561_s8, 1024  ;;  %p1563_p1 = scmp.lt.s32.totalorder %s1863_s28, %s1561_s8 }
  0x4b   : > { %p1558_p9 = pnand %p1556_p8, %p1821_p4  ;;  %p1564_p11 = scmp.lt.s32.totalorder %s1562_s26, %s1555_s30 }
  0x4d   : > { %p1559_p12 = pneg %p1558_p9  ;;  %p1565_p6 = por %p1564_p11, %p1563_p1 }
  0x4f   : > { %p1566_p13 = pnand %p1565_p6, %p1559_p12 }
  0x51   : > { %1569 = shalt.err (!%p1566_p13)
}
  0x52   : > { %s2144_s16 = smov 8   ;;  %s2145_s20 = smov 128  }
  0x53   : > { %1414 = dma.hbm_to_vmem [thread:$0]  (!%p1799_p0), %s1860_s23, 512, %s1863_s28, %s1873_s1, %s2145_s20, %s2145_s20, %s2144_s16  }
  0x54   : > { %s238_s10 = scalar_lea.vmem [#allocation11], %s1792_s29  ;;  %s1570_s22 = scalar_lea.hbm %s1869_s19, 512 }
  0x55   : > { %s248_s5 = sshll.u32 %s238_s10, 4  ;;  %p1571_p11 = scmp.ne.s32.totalorder %s1869_s19, %s1570_s22  ;;  %s1901_s5 = int_to_ptr.vmem [resolvable:$true] %s248_s5 }
  0x56   : > { %s1575_s6 = scalar_lea.hbm %s2118_s2, 1024  ;;  %p1576_p5 = scmp.lt.u32.totalorder %s1869_s19, %s2118_s2 }
  0x57   : > { %p1573_p2 = pnand %p1571_p11, %p1821_p4  ;;  %p1577_p7 = scmp.lt.u32.totalorder %s1575_s6, %s1570_s22 }
  0x58   : > { %p1579_p8 = scmp.lt.u32.totalorder %s1570_s22, %s1869_s19 }
  0x59   : > { %p1574_p3 = pneg %p1573_p2  ;;  %p1578_p10 = por %p1577_p7, %p1576_p5 }
  0x5b   : > { %p1580_p9 = por %p1579_p8, %p1578_p10 }
  0x5d   : > { %p1581_p12 = pnand %p1580_p9, %p1574_p3 }
  0x5f   : > { %1584 = shalt.err (!%p1581_p12)
}
  0x60   : > { %s1585_s1 = scalar_lea.vmem %s1901_s5, 512  ;;  %s1692_s28 = smov [#allocation11]  }
  0x61   : > { %p1586_p1 = scmp.ne.s32.totalorder %s1901_s5, %s1585_s1  ;;  %s1590_s29 = sshll.u32 %s1692_s28, 4  ;;  %s1591_s29 = int_to_ptr.vmem [resolvable:$false] %s1590_s29 }
  0x62   : > { %s1592_s23 = scalar_lea.vmem %s1591_s29, 1024  ;;  %p1593_p11 = scmp.lt.s32.totalorder %s1901_s5, %s1591_s29 }
  0x63   : > { %p1588_p6 = pnand %p1586_p1, %p1821_p4  ;;  %p1594_p2 = scmp.lt.s32.totalorder %s1592_s23, %s1585_s1 }
  0x65   : > { %p1589_p13 = pneg %p1588_p6  ;;  %p1595_p5 = por %p1594_p2, %p1593_p11 }
  0x67   : > { %p1596_p7 = pnand %p1595_p5, %p1589_p13 }
  0x69   : > { %1599 = shalt.err (!%p1596_p7)
}
  0x6a   : > { %1420 = dma.hbm_to_vmem [thread:$0]  (!%p1799_p0), %s1869_s19, 512, %s1901_s5, %s1815_s11, %s2145_s20, %s2145_s20, %s2144_s16  }
  0x6b   : > { %p2146_p4 = scmp.ne.s32.totalorder %s2142_s9, 0 }
  0x6c   : > { %s1931_s21 = sand.u32 (!%p2146_p4), 1, %s1670_s13   ;;  %p2147_p3 = scmp.ne.s32.totalorder (!%p2146_p4), %s2133_s24, 0 }
  0x6d   : > { %260 = sbr.rel (%p2146_p4) target bundleno = 1068 (0x42c), region = 32  ;;  %s1934_s10 = sshll.u32 (!%p2146_p4), %s1931_s21, 5 }
  0x6e   : > { %s263_s4 = scalar_lea.sflag (!%p2146_p4), [#allocation7], %s1931_s21  ;;  %s1938_s22 = scalar_lea.vmem (!%p2146_p4), [#allocation6], %s1934_s10 }
  0x74   : > { %1653 = dma.done.wait (%p2147_p3), %s263_s4, 512  }
  0x75   : > { %1655 = vsyncadd (%p2147_p3), %s263_s4, 4294966784  ;;  %s271_s11 = sand.u32 1, %s1752_s18   ;;  %s1946_s9 = scalar_lea.vmem [#allocation9], %s1934_s10 }
  0x76   : > { %s272_s19 = scalar_lea.sflag [#allocation10], %s271_s11 }
  0x77   : > { %1657 = dma.done.wait (%p2147_p3), %s272_s19, 1024  }
  0x78   : > { %1659 = vsyncadd (%p2147_p3), %s272_s19, 4294966272  ;;  %vm333_vm0 = vcmask 261120   ;;  %v1693_v0 = vmov 0.0   ;;  %vm1694_vm1 = vmmov 0   ;;  %v354_v1 = vld [vmem:[%s1946_s9] sm:$0xff]  ;;  %v355_v3 = vld [vmem:[%s1946_s9 + $0x8] sm:$0xff] }
  0x79   : > { %1363 = vmatprep.subr.mxu0 %v1693_v0  ;;  %334 = vst.msk [vmem:[#allocation4] sm:$0xff] %vm333_vm0, %v1693_v0  ;;  %335 = vst.msk [vmem:[#allocation4 + $0x8] sm:$0xff] %vm333_vm0, %v1693_v0  ;;  %1365 = vmatprep.mubr.msk.f32.mxu0 %vm1694_vm1, %v1693_v0  ;;  %v338_v2 = vld [vmem:[%s1938_s22] sm:$0xff]  ;;  %v339_v5 = vld [vmem:[%s1938_s22 + $0x8] sm:$0xff]  ;;  %vm324_vm2 = vcmask 7168   ;;  %v1695_v17 = vmov -inf  }
  0x7a   : > { %336 = vst.msk [vmem:[#allocation4 + $0x10] sm:$0xff] %vm333_vm0, %v1693_v0  ;;  %337 = vst.msk [vmem:[#allocation4 + $0x18] sm:$0xff] %vm333_vm0, %v1693_v0  ;;  %1368 = vmatprep.subr.mxu1 %v1693_v0  ;;  %1370 = vmatprep.mubr.msk.f32.mxu1 %vm1694_vm1, %v1693_v0  ;;  %v342_v4 = vmul.f32 0.17677669, %v338_v2  ;;  %v340_v6 = vld [vmem:[%s1938_s22 + $0x10] sm:$0xff]  ;;  %v341_v9 = vld [vmem:[%s1938_s22 + $0x18] sm:$0xff] }
  0x7b   : > { %1364 = vmatpush3.xpose.msk.msra.mxu0 %vm333_vm0, %v354_v1  ;;  %1369 = vmatpush3.xpose.msk.msra.mxu1 %vm333_vm0, %v355_v3  ;;  %v343_v7 = vmul.f32 0.17677669, %v339_v5  ;;  %v344_v8 = vmul.f32 0.17677669, %v340_v6  ;;  %v345_v10 = vmul.f32 0.17677669, %v341_v9 }
  0x7c   : > { %1373 = vmatprep.subr.mxu0 %v1693_v0  ;;  %1378 = vmatprep.subr.mxu1 %v1693_v0  ;;  %346 = vst.msk [vmem:[#allocation5] sm:$0xff] %vm333_vm0, %v342_v4  ;;  %v356_v11 = vld [vmem:[%s1946_s9 + $0x10] sm:$0xff]  ;;  %v357_v13 = vld [vmem:[%s1946_s9 + $0x18] sm:$0xff]  ;;  %vm671_vm3 = vcmask 64512   ;;  %v1696_v30 = vmov 0   ;;  %s284_s18 = scalar_lea.vmem [#allocation11], %s1934_s10 }
  0x7d   : > { %347 = vst.msk [vmem:[#allocation5 + $0x8] sm:$0xff] %vm333_vm0, %v343_v7  ;;  %348 = vst.msk [vmem:[#allocation5 + $0x10] sm:$0xff] %vm333_vm0, %v344_v8  ;;  %1484 = vset.pattern.permute.xlu0 %v1696_v30  ;;  %1485 = vset.pattern.permute.xlu1 %v1696_v30  ;;  %v358_v47 = vld [vmem:[%s284_s18] sm:$0xff]  ;;  %v359_v48 = vld [vmem:[%s284_s18 + $0x8] sm:$0xff]  ;;  %s1697_s24 = smov 32   ;;  %s1698_s16 = smov 64  }
  0x7e   : > { %349 = vst.msk [vmem:[#allocation5 + $0x18] sm:$0xff] %vm333_vm0, %v345_v10  ;;  %v360_v60 = vld [vmem:[%s284_s18 + $0x10] sm:$0xff]  ;;  %v361_v63 = vld [vmem:[%s284_s18 + $0x18] sm:$0xff]  ;;  %s1699_s20 = smov 96   ;;  %s1327_s5 = sshll.u32 %s1931_s21, 3  ;;  %vm1148_vm4 = vcmask 523264  }
  0x7f   : > { %325 = vst.msk [vmem:[#allocation2] sm:$0xff] %vm324_vm2, %v1695_v17  ;;  %326 = vst.msk [vmem:[#allocation2 + $0x8] sm:$0xff] %vm324_vm2, %v1695_v17  ;;  %s1341_s7 = sshll.u32 %s1678_s15, 7  ;;  %s316_s30 = scalar_lea.vmem [#allocation12], %s1327_s5  ;;  %vm1150_vm5 = vcmask 785408  }
  0x80   : > { %327 = vst.msk [vmem:[#allocation2 + $0x10] sm:$0xff] %vm324_vm2, %v1695_v17  ;;  %328 = vst.msk [vmem:[#allocation2 + $0x18] sm:$0xff] %vm324_vm2, %v1695_v17  ;;  %s1169_s6 = sshll.u32 %s316_s30, 4  ;;  %s2067_s1 = scalar_lea.hbm %s2119_s3, %s1341_s7  ;;  %s2069_s6 = int_to_ptr.vmem [resolvable:$true] %s1169_s6 }
  0x81   : > { %329 = vst.msk [vmem:[#allocation3] sm:$0xff] %vm324_vm2, %v1693_v0  ;;  %330 = vst.msk [vmem:[#allocation3 + $0x8] sm:$0xff] %vm324_vm2, %v1693_v0  ;;  %s1154_s15 = scalar_lea.sflag [#allocation8], %s1931_s21  ;;  %s1600_s28 = scalar_lea.vmem %s2069_s6, 128 }
  0x82   : > { %331 = vst.msk [vmem:[#allocation3 + $0x10] sm:$0xff] %vm324_vm2, %v1693_v0  ;;  %332 = vst.msk [vmem:[#allocation3 + $0x18] sm:$0xff] %vm324_vm2, %v1693_v0  ;;  %p1601_p0 = scmp.ne.s32.totalorder %s2069_s6, %s1600_s28  ;;  %p2148_p10 = scmp.ne.s32.totalorder %s2134_s25, 0 }
  0x83   : > { %v350_v12 = vld [vmem:[#allocation5] sm:$0xff]  ;;  %s1700_s29 = smov [#allocation12]  }
  0x84   : > { %1366 = vmatmul.mubr.msk.f32.vlgmr.msra.gmra.mrb[0].mxu0 %vm333_vm0, %v350_v12  ;;  %v351_v14 = vld [vmem:[#allocation5 + $0x8] sm:$0xff]  ;;  %v352_v15 = vld [vmem:[#allocation5 + $0x10] sm:$0xff]  ;;  %p1602_p8 = pnand %p1601_p0, %p2148_p10  ;;  %s1604_s23 = sshll.u32 %s1700_s29, 4  ;;  %s1605_s23 = int_to_ptr.vmem [resolvable:$false] %s1604_s23 }
  0x85   : > { %1371 = vmatmul.mubr.msk.f32.vlgmr.msra.gmra.mrb[0].mxu1 %vm333_vm0, %v351_v14  ;;  %1374 = vmatpush3.xpose.msk.msra.mxu0 %vm333_vm0, %v356_v11  ;;  %v353_v16 = vld [vmem:[#allocation5 + $0x18] sm:$0xff]  ;;  %s1606_s10 = scalar_lea.vmem %s1605_s23, 256  ;;  %p1607_p12 = scmp.lt.s32.totalorder %s2069_s6, %s1605_s23 }
  0x86   : > { %1375 = vmatprep.mubr.msk.f32.mxu0 %vm1694_vm1, %v1693_v0  ;;  %1379 = vmatpush3.xpose.msk.msra.mxu1 %vm333_vm0, %v357_v13  ;;  %v2014_v31 = vld [vmem:[#allocation2] sm:$0xff]  ;;  %v2019_v34 = vld [vmem:[#allocation2 + $0x8] sm:$0xff]  ;;  %p1603_p9 = pneg %p1602_p8  ;;  %p1608_p1 = scmp.lt.s32.totalorder %s1606_s10, %s1600_s28 }
  0x87   : > { %1380 = vmatprep.mubr.msk.f32.mxu1 %vm1694_vm1, %v1693_v0  ;;  %1383 = vmatprep.subr.mxu0 %v1693_v0  ;;  %v2021_v35 = vld [vmem:[#allocation2 + $0x10] sm:$0xff]  ;;  %v670_v41 = vld [vmem:[#allocation2 + $0x18] sm:$0xff] }
  0x88   : > { %1376 = vmatmul.mubr.msk.f32.vlgmr.msra.gmra.mrb[2].mxu0 %vm333_vm0, %v352_v15  ;;  %1388 = vmatprep.subr.mxu1 %v1693_v0  ;;  %v733_v14 = vld [vmem:[#allocation3 + $0x8] sm:$0xff]  ;;  %p1609_p6 = por %p1608_p1, %p1607_p12 }
  0x89   : > { %1381 = vmatmul.mubr.msk.f32.vlgmr.msra.gmra.mrb[2].mxu1 %vm333_vm0, %v353_v16  ;;  %1385 = vmatprep.mubr.msk.f32.mxu0 %vm1694_vm1, %v1693_v0  ;;  %v734_v17 = vld [vmem:[#allocation3 + $0x10] sm:$0xff] }
  0x8a   : > { %1390 = vmatprep.mubr.msk.f32.mxu1 %vm1694_vm1, %v1693_v0  ;;  %1384 = vmatpush3.msra.mxu0 %v358_v47  ;;  %p1610_p13 = pnand %p1609_p6, %p1603_p9 }
  0x8b   : > { %1393 = vmatprep.subr.mxu0 %v1693_v0  ;;  %1389 = vmatpush3.msra.mxu1 %v359_v48 }
  0x8c   : > { %1398 = vmatprep.subr.mxu1 %v1693_v0 }
 0x157   : > { %v435_v18 = vpop.f32.mrb[0].mxu0 }
 0x158   : > { %v1367_v19 = vpop.f32.mrb[1].mxu0  ;;  %v672_v20 = vsel %vm671_vm3, %v435_v18, -inf  ;;  %v511_v21 = vpop.f32.mrb[0].mxu1 }
 0x159   : > { %673 = vmax.xlane.f32.xlu0 %v672_v20  ;;  %v1372_v22 = vpop.f32.mrb[1].mxu1  ;;  %v675_v23 = vsel %vm671_vm3, %v511_v21, -inf }
 0x15b   : > { %v587_v24 = vpop.f32.mrb[2].mxu0 }
 0x15c   : > { %v1377_v25 = vpop.f32.mrb[3].mxu0  ;;  %v678_v26 = vsel %vm671_vm3, %v587_v24, -inf  ;;  %v663_v27 = vpop.f32.mrb[2].mxu1 }
 0x15d   : > { %676 = vmax.xlane.f32.xlu0 %v675_v23  ;;  %679 = vmax.xlane.f32.xlu1 %v678_v26  ;;  %v1382_v28 = vpop.f32.mrb[3].mxu1  ;;  %v681_v29 = vsel %vm671_vm3, %v663_v27, -inf  ;;  %v732_v26 = vld [vmem:[#allocation3] sm:$0xff] }
 0x161   : > { %682 = vmax.xlane.f32.xlu1 %v681_v29 }
 0x1e6   : > { %v674_v32 = vpop.xlane.xlu0 %673 }
 0x1e7   : > { %v2017_v33 = vmax.f32 %v2014_v31, %v674_v32 }
 0x1e9   : > { %v688_v36 = vsub.f32 %v2014_v31, %v2017_v33  ;;  %1089 = vst.msk [vmem:[#allocation2] sm:$0xff] %vm324_vm2, %v2017_v33  ;;  %702 = vperm.xlu0 %1484, %v2017_v33  }
 0x1ea   : > { %v677_v37 = vpop.xlane.xlu0 %676  ;;  %v680_v38 = vpop.xlane.xlu1 %679 }
 0x1eb   : > { %v685_v39 = vmax.f32 %v2019_v34, %v677_v37  ;;  %v686_v40 = vmax.f32 %v2021_v35, %v680_v38  ;;  %v692_v13 = vmul.f32 1.442695, %v688_v36 }
 0x1ed   : > { %v689_v42 = vsub.f32 %v2019_v34, %v685_v39  ;;  %1090 = vst.msk [vmem:[#allocation2 + $0x8] sm:$0xff] %vm324_vm2, %v685_v39  ;;  %707 = vperm.xlu1 %1485, %v685_v39   ;;  %v690_v43 = vsub.f32 %v2021_v35, %v686_v40  ;;  %1091 = vst.msk [vmem:[#allocation2 + $0x10] sm:$0xff] %vm324_vm2, %v686_v40  ;;  %v1054_v39 = vld [vmem:[#allocation4 + $0x8] sm:$0xff] }
 0x1ee   : > { %v683_v44 = vpop.xlane.xlu1 %682 }
 0x1ef   : > { %v687_v45 = vmax.f32 %v670_v41, %v683_v44  ;;  %v696_v7 = vmul.f32 1.442695, %v690_v43  ;;  %v694_v9 = vmul.f32 1.442695, %v689_v42  ;;  %v1055_v44 = vld [vmem:[#allocation4 + $0x10] sm:$0xff] }
 0x1f1   : > { %712 = vperm.xlu1 %1485, %v686_v40   ;;  %v691_v46 = vsub.f32 %v670_v41, %v687_v45  ;;  %1092 = vst.msk [vmem:[#allocation2 + $0x18] sm:$0xff] %vm324_vm2, %v687_v45 }
 0x1f5   : > { %717 = vperm.xlu1 %1485, %v687_v45  }
 0x268   : > { %v703_v49 = vpop.permute.xlu0 %702 }
 0x269   : > { %v720_v50 = vsub.f32 %v435_v18, %v703_v49 }
 0x26b   : > { %v724_v51 = vmul.f32 1.442695, %v720_v50  ;;  %v1056_v50 = vld [vmem:[#allocation4 + $0x18] sm:$0xff] }
 0x26c   : > { %v708_v52 = vpop.permute.xlu1 %707 }
 0x26d   : > { %1486 = vpow2.f32 %v724_v51  ;;  %v721_v53 = vsub.f32 %v511_v21, %v708_v52  ;;  %v735_v21 = vld [vmem:[#allocation3 + $0x18] sm:$0xff] }
 0x26f   : > { %v726_v54 = vmul.f32 1.442695, %v721_v53 }
 0x270   : > { %v713_v55 = vpop.permute.xlu1 %712 }
 0x271   : > { %1488 = vpow2.f32 %v726_v54  ;;  %v722_v56 = vsub.f32 %v587_v24, %v713_v55 }
 0x273   : > { %v728_v57 = vmul.f32 1.442695, %v722_v56 }
 0x274   : > { %v718_v58 = vpop.permute.xlu1 %717 }
 0x275   : > { %1490 = vpow2.f32 %v728_v57  ;;  %v723_v59 = vsub.f32 %v663_v27, %v718_v58 }
 0x277   : > { %v1487_v61 = vpop.eup %1486  ;;  %v730_v62 = vmul.f32 1.442695, %v723_v59 }
 0x278   : > { %1386 = vmatmul.mubr.msk.f32.vlgmr.msra.gmra.mrb[4].mxu0 %vm671_vm3, %v1487_v61  ;;  %v740_v8 = vsel %vm671_vm3, %v1487_v61, 0.0 }
 0x279   : > { %1492 = vpow2.f32 %v730_v62  ;;  %1394 = vmatpush3.msra.mxu0 %v360_v60  ;;  %1395 = vmatprep.mubr.msk.f32.mxu0 %vm1694_vm1, %v1693_v0 }
 0x27a   : > { %1494 = vpow2.f32 %v696_v7 }
 0x27b   : > { %v1489_v1 = vpop.eup %1488  ;;  %1496 = vpow2.f32 %v694_v9 }
 0x27c   : > { %1391 = vmatmul.mubr.msk.f32.vlgmr.msra.gmra.mrb[4].mxu1 %vm671_vm3, %v1489_v1  ;;  %v743_v2 = vsel %vm671_vm3, %v1489_v1, 0.0 }
 0x27d   : > { %744 = vadd.xlane.f32.xlu1 %v743_v2  ;;  %1399 = vmatpush3.msra.mxu1 %v361_v63  ;;  %v1053_v2 = vld [vmem:[#allocation4] sm:$0xff] }
 0x27e   : > { %1400 = vmatprep.mubr.msk.f32.mxu1 %vm1694_vm1, %v1693_v0  ;;  %v698_v0 = vmul.f32 1.442695, %v691_v46 }
 0x27f   : > { %v1491_v3 = vpop.eup %1490 }
 0x280   : > { %1396 = vmatmul.mubr.msk.f32.vlgmr.msra.gmra.mrb[6].mxu0 %vm671_vm3, %v1491_v3  ;;  %v746_v4 = vsel %vm671_vm3, %v1491_v3, 0.0  ;;  %1498 = vpow2.f32 %v698_v0 }
 0x281   : > { %747 = vadd.xlane.f32.xlu0 %v746_v4  ;;  %1500 = vpow2.f32 %v692_v13 }
 0x283   : > { %v1493_v5 = vpop.eup %1492 }
 0x284   : > { %1401 = vmatmul.mubr.msk.f32.vlgmr.msra.gmra.mrb[6].mxu1 %vm671_vm3, %v1493_v5  ;;  %v749_v6 = vsel %vm671_vm3, %v1493_v5, 0.0  ;;  %v1495_v10 = vpop.eup %1494 }
 0x285   : > { %750 = vadd.xlane.f32.xlu1 %v749_v6  ;;  %v1497_v11 = vpop.eup %1496  ;;  %v738_v19 = vmul.f32 %v1495_v10, %v734_v17 }
 0x286   : > { %v737_v15 = vmul.f32 %v1497_v11, %v733_v14 }
 0x289   : > { %741 = vadd.xlane.f32.xlu1 %v740_v8 }
 0x28a   : > { %v1499_v12 = vpop.eup %1498 }
 0x28b   : > { %v739_v23 = vmul.f32 %v1499_v12, %v735_v21  ;;  %v1501_v24 = vpop.eup %1500 }
 0x28c   : > { %v736_v29 = vmul.f32 %v1501_v24, %v732_v26 }
 0x297   : > { %1069 = vperm.xlu0 %1484, %v1495_v10  }
 0x29a   : > { %1064 = vperm.xlu1 %1485, %v1497_v11  }
 0x29e   : > { %1074 = vperm.xlu1 %1485, %v1499_v12  }
 0x30a   : > { %v745_v16 = vpop.xlane.xlu1 %744 }
 0x30b   : > { %v753_v18 = vadd.f32 %v745_v16, %v737_v15 }
 0x30d   : > { %758 = vst.msk [vmem:[#allocation3 + $0x8] sm:$0xff] %vm324_vm2, %v753_v18 }
 0x30e   : > { %v748_v20 = vpop.xlane.xlu0 %747 }
 0x30f   : > { %v754_v22 = vadd.f32 %v748_v20, %v738_v19 }
 0x311   : > { %759 = vst.msk [vmem:[#allocation3 + $0x10] sm:$0xff] %vm324_vm2, %v754_v22 }
 0x312   : > { %v751_v25 = vpop.xlane.xlu1 %750 }
 0x313   : > { %v755_v27 = vadd.f32 %v751_v25, %v739_v23 }
 0x314   : > { %v1097_v28 = vld [vmem:[#allocation3 + $0x8] sm:$0xff] }
 0x315   : > { %760 = vst.msk [vmem:[#allocation3 + $0x18] sm:$0xff] %vm324_vm2, %v755_v27  ;;  %1502 = vrcp.f32 %v1097_v28 }
 0x316   : > { %v742_v30 = vpop.xlane.xlu1 %741  ;;  %v1070_v45 = vpop.permute.xlu0 %1069 }
 0x317   : > { %v752_v31 = vadd.f32 %v742_v30, %v736_v29  ;;  %v1079_v49 = vmul.f32 %v1070_v45, %v1055_v44 }
 0x318   : > { %v1098_v32 = vld [vmem:[#allocation3 + $0x10] sm:$0xff] }
 0x319   : > { %757 = vst.msk [vmem:[#allocation3] sm:$0xff] %vm324_vm2, %v752_v31  ;;  %1504 = vrcp.f32 %v1098_v32 }
 0x31a   : > { %v1065_v40 = vpop.permute.xlu1 %1064 }
 0x31b   : > { %v1078_v43 = vmul.f32 %v1065_v40, %v1054_v39 }
 0x31c   : > { %v1099_v33 = vld [vmem:[#allocation3 + $0x18] sm:$0xff] }
 0x31d   : > { %1506 = vrcp.f32 %v1099_v33 }
 0x31e   : > { %v1075_v51 = vpop.permute.xlu1 %1074 }
 0x31f   : > { %v1503_v34 = vpop.eup %1502  ;;  %v1080_v55 = vmul.f32 %v1075_v51, %v1056_v50 }
 0x320   : > { %1115 = vperm.xlu1 %1485, %v1503_v34   ;;  %v1096_v35 = vld [vmem:[#allocation3] sm:$0xff] }
 0x321   : > { %1508 = vrcp.f32 %v1096_v35 }
 0x323   : > { %v1505_v36 = vpop.eup %1504 }
 0x324   : > { %1123 = vperm.xlu1 %1485, %v1505_v36  }
 0x327   : > { %v1507_v37 = vpop.eup %1506 }
 0x328   : > { %1131 = vperm.xlu0 %1484, %v1507_v37   ;;  %1059 = vperm.xlu1 %1485, %v1501_v24  }
 0x32b   : > { %v1509_v38 = vpop.eup %1508 }
 0x32c   : > { %1107 = vperm.xlu0 %1484, %v1509_v38  }
 0x34b   : > { %v830_v41 = vpop.f32.mrb[4].mxu0 }
 0x34c   : > { %v1387_v42 = vpop.f32.mrb[5].mxu0 }
 0x34f   : > { %v903_v46 = vpop.f32.mrb[4].mxu1 }
 0x350   : > { %v1082_v47 = vadd.f32 %v1078_v43, %v903_v46  ;;  %v1392_v48 = vpop.f32.mrb[5].mxu1 }
 0x352   : > { %1086 = vst.msk [vmem:[#allocation4 + $0x8] sm:$0xff] %vm333_vm0, %v1082_v47 }
 0x353   : > { %v976_v52 = vpop.f32.mrb[6].mxu0 }
 0x354   : > { %v1083_v53 = vadd.f32 %v1079_v49, %v976_v52  ;;  %v1397_v54 = vpop.f32.mrb[7].mxu0 }
 0x356   : > { %1087 = vst.msk [vmem:[#allocation4 + $0x10] sm:$0xff] %vm333_vm0, %v1083_v53 }
 0x357   : > { %v1049_v56 = vpop.f32.mrb[6].mxu1 }
 0x358   : > { %v1084_v57 = vadd.f32 %v1080_v55, %v1049_v56  ;;  %v1402_v58 = vpop.f32.mrb[7].mxu1 }
 0x359   : > { %v1112_v59 = vld [vmem:[#allocation4 + $0x8] sm:$0xff] }
 0x35a   : > { %1088 = vst.msk [vmem:[#allocation4 + $0x18] sm:$0xff] %vm333_vm0, %v1084_v57 }
 0x35d   : > { %v1120_v63 = vld [vmem:[#allocation4 + $0x10] sm:$0xff] }
 0x361   : > { %v1128_v3 = vld [vmem:[#allocation4 + $0x18] sm:$0xff] }
 0x39f   : > { %v1116_v60 = vpop.permute.xlu1 %1115 }
 0x3a0   : > { %v1118_v61 = vmul.f32 %v1116_v60, %v1112_v59 }
 0x3a2   : > { %1136 = vrot.lane.b32.xlu1 %v1118_v61, %s1697_s24 }
 0x3a3   : > { %v1124_v62 = vpop.permute.xlu1 %1123 }
 0x3a4   : > { %v1126_v1 = vmul.f32 %v1124_v62, %v1120_v63 }
 0x3a6   : > { %1140 = vrot.lane.b32.xlu0 %v1126_v1, %s1698_s16 }
 0x3a7   : > { %v1132_v4 = vpop.permute.xlu0 %1131  ;;  %v1060_v5 = vpop.permute.xlu1 %1059 }
 0x3a8   : > { %v1134_v6 = vmul.f32 %v1132_v4, %v1128_v3  ;;  %v1077_v7 = vmul.f32 %v1060_v5, %v1053_v2 }
 0x3aa   : > { %v1081_v8 = vadd.f32 %v1077_v7, %v830_v41  ;;  %1144 = vrot.lane.b32.xlu1 %v1134_v6, %s1699_s20 }
 0x3ab   : > { %v1108_v9 = vpop.permute.xlu0 %1107 }
 0x3ac   : > { %1085 = vst.msk [vmem:[#allocation4] sm:$0xff] %vm333_vm0, %v1081_v8 }
 0x3b3   : > { %v1104_v0 = vld [vmem:[#allocation4] sm:$0xff] }
 0x3b4   : > { %v1110_v11 = vmul.f32 %v1108_v9, %v1104_v0 }
 0x414   : > { %v1137_v10 = vpop.permute.xlu1 %1136 }
 0x415   : > { %v1147_v13 = vsel %vm333_vm0, %v1110_v11, %v1137_v10 }
 0x418   : > { %v1141_v12 = vpop.permute.xlu0 %1140 }
 0x419   : > { %v1149_v14 = vsel %vm1148_vm4, %v1147_v13, %v1141_v12 }
 0x41c   : > { %v1145_v15 = vpop.permute.xlu1 %1144 }
 0x41d   : > { %v1151_v16 = vsel %vm1150_vm5, %v1149_v14, %v1145_v15 }
 0x41e   : > { %1152 = vst [vmem:[%s316_s30] sm:$0xff] %v1151_v16 }
 0x41f   : > { %1613 = shalt.err (!%p1610_p13)
}
 0x420   : > { %s1614_s21 = scalar_lea.hbm %s2067_s1, 128  ;;  %s1618_s11 = scalar_lea.hbm %s2119_s3, 256 }
 0x421   : > { %p1615_p11 = scmp.ne.s32.totalorder %s2067_s1, %s1614_s21  ;;  %p1619_p7 = scmp.lt.u32.totalorder %s2067_s1, %s2119_s3 }
 0x422   : > { %p1620_p4 = scmp.lt.u32.totalorder %s1618_s11, %s1614_s21  ;;  %p1622_p0 = scmp.lt.u32.totalorder %s1614_s21, %s2067_s1 }
 0x423   : > { %p1616_p2 = pnand %p1615_p11, %p2148_p10 }
 0x424   : > { %p1621_p3 = por %p1620_p4, %p1619_p7 }
 0x425   : > { %p1617_p5 = pneg %p1616_p2 }
 0x426   : > { %p1623_p8 = por %p1622_p0, %p1621_p3 }
 0x428   : > { %p1624_p9 = pnand %p1623_p8, %p1617_p5 }
 0x42a   : > { %1627 = shalt.err (!%p1624_p9)
}
 0x42b   : > { %1409 = dma.vmem_to_hbm [thread:$0]  (%p2148_p10), %s2069_s6, 128, %s2067_s1, %s1154_s15  }
 0x42c PF: > { %s1181_s18 = sand.u32 1, %s1666_s12   ;;  %p2149_p12 = scmp.ne.s32.totalorder %s2136_s27, 0 }
 0x42d   : > { %p2150_p1 = scmp.ge.s32.totalorder %s1686_s17, 2  ;;  %s1182_s24 = scalar_lea.sflag [#allocation8], %s1181_s18 }
 0x42f   : > { %p1422_p6 = pnand %p2150_p1, %p2149_p12 }
 0x431   : > { %1661 = dma.done.wait (!%p1422_p6), %s1182_s24, 128  }
 0x432   : > { %1663 = vsyncadd (!%p1422_p6), %s1182_s24, 4294967168  ;;  %s22_s17 = sadd.s32 1, %s1686_s17   ;;  %s2151_s25 = sld [smem:[#allocation18_spill]] }
 0x433   : > { %p19_p13 = scmp.ge.s32.totalorder %s22_s17, 4   ;;  %s2152_s15 = sld [smem:[#allocation16_spill]] }
 0x434   : > { %s2153_s16 = sld [smem:[#allocation17_spill]]  ;;  %s2154_s12 = smov %s1670_s13 }
 0x435   : > { %s2155_s13 = smov %s1674_s14  ;;  %21 = sbr.rel (!%p19_p13) target bundleno = 10 (0xa), region = 112 }
 0x438   : > { %s2156_s14 = smov %s2151_s25 }
 0x43c   :  { %1187 = vsyncpa [#allocation7], 1 }
 0x43d   :  { %1189 = vsyncpa [#allocation7 + $0x1], 1 }
 0x43e   :  { %1190 = vsyncpa [#allocation10], 1 }
 0x43f   :  { %1192 = vsyncpa [#allocation10 + $0x1], 1 }
 0x440   :  { %1193 = vsyncpa [#allocation8], 1 }
 0x441   :  { %1195 = vsyncpa [#allocation8 + $0x1], 1 }

</bundles_post_ra>
